<compile_context>
chip_gen: v5e
topology: v5e:2x2
jax: 0.10.0
libtpu: 0.0.40
codegen_flags: <defaults>
</compile_context>

<pallas_src>
import functools

import jax
import jax.numpy as jnp
from jax.experimental import pallas as pl
from jax.experimental.pallas import tpu as pltpu

EPS_BN = 1e-5
EPS_LN = 1e-5
LANE = 128
_VMEM_LIMIT = 48 * 1024 * 1024   # above the 16/32 MiB scoped defaults, below v7x physical


def _rup(x, m):
    return ((x + m - 1) // m) * m


def _pad_to(a, shape):
    pads = [(0, t - s) for s, t in zip(a.shape, shape)]
    if all(p == (0, 0) for p in pads):
        return a
    return jnp.pad(a, pads)


# ----------------------------- Pallas kernels ------------------------------ #

def _mm_bn_kernel(x_ref, w_ref, scale_ref, bias_ref, o_ref, *, apply_relu):
    """out = (x @ w) * scale + bias, optional ReLU (1x1 conv + folded BN)."""
    acc = jnp.dot(x_ref[...], w_ref[...], preferred_element_type=jnp.float32)
    acc = acc * scale_ref[...] + bias_ref[...]
    if apply_relu:
        acc = jnp.maximum(acc, 0.0)
    o_ref[...] = acc.astype(o_ref.dtype)


def fused_matmul_bn(x, w, scale, bias, *, apply_relu, out_dtype=jnp.bfloat16, tm=256):
    """x:[M,K] @ w:[K,Cout] with folded-BN epilogue; rows tiled by tm over a cdiv grid."""
    M, K = x.shape
    Kw, Cout = w.shape
    assert K == Kw
    grid_m = pl.cdiv(M, tm)
    Mp = grid_m * tm
    if Mp != M:                       # pad rows instead of collapsing to one huge block
        x = jnp.pad(x, ((0, Mp - M), (0, 0)))
    kernel = functools.partial(_mm_bn_kernel, apply_relu=apply_relu)
    out = pl.pallas_call(
        kernel,
        out_shape=jax.ShapeDtypeStruct((Mp, Cout), out_dtype),
        grid=(grid_m,),
        in_specs=[
            pl.BlockSpec((tm, K), lambda i: (i, 0)),
            pl.BlockSpec((K, Cout), lambda i: (0, 0)),
            pl.BlockSpec((1, Cout), lambda i: (0, 0)),
            pl.BlockSpec((1, Cout), lambda i: (0, 0)),
        ],
        out_specs=pl.BlockSpec((tm, Cout), lambda i: (i, 0)),
        compiler_params=pltpu.CompilerParams(
            dimension_semantics=("parallel",),
            vmem_limit_bytes=_VMEM_LIMIT),
    )(x, w, scale, bias)
    return out if Mp == M else out[:M]


def _conv3x3_bn_kernel(x_ref, w_ref, scale_ref, bias_ref, o_ref, *, H, W, d):
    """3x3 (dilated) conv on one spatially padded sample as 9 shifted MXU matmuls."""
    C = w_ref.shape[2]
    acc = jnp.zeros((H * W, C), jnp.float32)
    for ky in range(3):
        for kx in range(3):
            patch = x_ref[0, ky * d:ky * d + H, kx * d:kx * d + W, :]
            patch = patch.reshape(H * W, patch.shape[-1])
            acc = acc + jnp.dot(patch, w_ref[ky * 3 + kx],
                                preferred_element_type=jnp.float32)
    acc = acc * scale_ref[...] + bias_ref[...]
    o_ref[0] = jnp.maximum(acc, 0.0).astype(o_ref.dtype)


def conv3x3_bn_relu(x_halo, w9, scale, bias, *, H, W, d):
    """x_halo:[N,H+2d,W+2d,Cp] bf16, w9:[9,Cp,Cp] bf16 -> [N,H*W,Cp] bf16."""
    N, Hp, Wp, Cp = x_halo.shape
    kernel = functools.partial(_conv3x3_bn_kernel, H=H, W=W, d=d)
    return pl.pallas_call(
        kernel,
        out_shape=jax.ShapeDtypeStruct((N, H * W, Cp), jnp.bfloat16),
        grid=(N,),
        in_specs=[
            pl.BlockSpec((1, Hp, Wp, Cp), lambda n: (n, 0, 0, 0)),
            pl.BlockSpec((9, Cp, Cp), lambda n: (0, 0, 0)),
            pl.BlockSpec((1, Cp), lambda n: (0, 0)),
            pl.BlockSpec((1, Cp), lambda n: (0, 0)),
        ],
        out_specs=pl.BlockSpec((1, H * W, Cp), lambda n: (n, 0, 0)),
        compiler_params=pltpu.CompilerParams(
            dimension_semantics=("parallel",),
            vmem_limit_bytes=_VMEM_LIMIT),
    )(x_halo, w9, scale, bias)


def _conv3_gcb_res_kernel(h2_ref, res_ref, w3_ref, s3_ref, b3_ref,
                          wm_ref, bm_ref, wa1_ref, ba1_ref,
                          lnw_ref, lnb_ref, wa2_ref, ba2_ref, o_ref, *, cr):
    """conv3(1x1)+BN3, GCNet ContextBlock (att pool + channel_add), residual, ReLU."""
    h2 = h2_ref[0]                                              # [HW, Cwp] bf16
    res = res_ref[0]                                            # [HW, C4p] f32

    # conv3 + folded BN3 on the MXU
    y = jnp.dot(h2, w3_ref[...], preferred_element_type=jnp.float32)
    y = y * s3_ref[...] + b3_ref[...]                           # [HW, C4p] f32

    # spatial attention pooling (conv_mask -> softmax over HW) on the MXU
    logits = jnp.dot(y, wm_ref[...], preferred_element_type=jnp.float32) + bm_ref[...]
    logits = logits - jnp.max(logits, axis=0, keepdims=True)    # [HW, 1]
    e = jnp.exp(logits)
    attn = e * pl.reciprocal(jnp.sum(e, axis=0, keepdims=True), approx=True)
    # context = attn^T @ y  (lhs-transposed matmul, stays on the MXU)
    context = jax.lax.dot_general(attn, y, (((0,), (0,)), ((), ())),
                                  preferred_element_type=jnp.float32)   # [1, C4p]

    # channel_add: 1x1 conv -> LayerNorm -> ReLU -> 1x1 conv
    # (LN statistics over the real Cr channels only; padded lanes masked out)
    t = jnp.dot(context, wa1_ref[...], preferred_element_type=jnp.float32) + ba1_ref[...]
    valid = jax.lax.broadcasted_iota(jnp.int32, t.shape, 1) < cr
    mu = jnp.sum(jnp.where(valid, t, 0.0), axis=1, keepdims=True) / cr
    var = jnp.sum(jnp.where(valid, (t - mu) ** 2, 0.0), axis=1, keepdims=True) / cr
    t = (t - mu) * jax.lax.rsqrt(var + EPS_LN)
    t = t * lnw_ref[...] + lnb_ref[...]          # padded lanes of lnw/lnb are zero
    t = jnp.maximum(t, 0.0)
    add = jnp.dot(t, wa2_ref[...], preferred_element_type=jnp.float32) + ba2_ref[...]

    o_ref[0] = jnp.maximum(y + add + res, 0.0).astype(o_ref.dtype)


def conv3_gcb_residual_relu(h2, res, w3, s3, b3, wm, bm,
                            wa1, ba1, lnw, lnb, wa2, ba2, *, cr):
    N, HW, Cwp = h2.shape
    C4p = w3.shape[1]
    Crp = wa1.shape[1]
    full2 = lambda shape: pl.BlockSpec(shape, lambda n: (0, 0))
    kernel = functools.partial(_conv3_gcb_res_kernel, cr=cr)
    return pl.pallas_call(
        kernel,
        out_shape=jax.ShapeDtypeStruct((N, HW, C4p), jnp.float32),
        grid=(N,),
        in_specs=[
            pl.BlockSpec((1, HW, Cwp), lambda n: (n, 0, 0)),
            pl.BlockSpec((1, HW, C4p), lambda n: (n, 0, 0)),
            full2((Cwp, C4p)),   # conv3 weight
            full2((1, C4p)),     # bn3 scale
            full2((1, C4p)),     # bn3 bias
            full2((C4p, 1)),     # conv_mask weight
            full2((1, 1)),       # conv_mask bias
            full2((C4p, Crp)),   # channel_add conv1 weight
            full2((1, Crp)),     # channel_add conv1 bias
            full2((1, Crp)),     # LayerNorm weight
            full2((1, Crp)),     # LayerNorm bias
            full2((Crp, C4p)),   # channel_add conv2 weight
            full2((1, C4p)),     # channel_add conv2 bias
        ],
        out_specs=pl.BlockSpec((1, HW, C4p), lambda n: (n, 0, 0)),
        compiler_params=pltpu.CompilerParams(
            dimension_semantics=("parallel",),
            vmem_limit_bytes=_VMEM_LIMIT),
    )(h2, res, w3, s3, b3, wm, bm, wa1, ba1, lnw, lnb, wa2, ba2)


# ------------------------------ parameters --------------------------------- #

def _bn_params(k, C):
    k1, k2, k3, k4 = jax.random.split(k, 4)
    return dict(
        gamma=jax.random.uniform(k1, (C,), jnp.float32, 0.5, 1.5),
        beta=0.1 * jax.random.normal(k2, (C,), jnp.float32),
        mean=0.1 * jax.random.normal(k3, (C,), jnp.float32),
        var=jax.random.uniform(k4, (C,), jnp.float32, 0.5, 1.5),
    )


def fold_bn(gamma, beta, mean, var):
    s = gamma / jnp.sqrt(var + EPS_BN)
    b = beta - mean * s
    return s.reshape(1, -1), b.reshape(1, -1)


def init_params(key, inplanes, planes, ratio, cardinality=1, dilation=1,
                bottleneck_width=64):
    Cw = int(planes * (bottleneck_width / 64.0)) * cardinality
    C4 = planes * 4
    Cr = int(C4 * ratio)
    ks = jax.random.split(key, 16)
    rn = lambda k, shape, s=0.1: s * jax.random.normal(k, shape, jnp.float32)
    p = {
        'dilation': dilation,
        'conv1_w': rn(ks[0], (Cw, inplanes, 1, 1)),
        'bn1': _bn_params(ks[1], Cw),
        'conv2_w': rn(ks[2], (Cw, Cw, 3, 3)),
        'bn2': _bn_params(ks[3], Cw),
        'conv3_w': rn(ks[4], (C4, Cw, 1, 1)),
        'bn3': _bn_params(ks[5], C4),
        # ContextBlock
        'mask_w': rn(ks[6], (1, C4, 1, 1)),
        'mask_b': rn(ks[7], (1,)),
        'ca1_w': rn(ks[8], (Cr, C4, 1, 1)),
        'ca1_b': rn(ks[9], (Cr,)),
        'ln_w': jax.random.uniform(ks[10], (Cr,), jnp.float32, 0.5, 1.5),
        'ln_b': rn(ks[11], (Cr,)),
        'ca2_w': rn(ks[12], (C4, Cr, 1, 1)),
        'ca2_b': rn(ks[13], (C4,)),
    }
    return p


# ----------------------------- forward passes ------------------------------ #

def bottleneck_forward_pallas(x_nchw, p):
    N, Cin, H, W = x_nchw.shape
    d = int(p['dilation'])
    Cw = p['conv1_w'].shape[0]
    C4 = p['conv3_w'].shape[0]
    Cr = p['ca1_w'].shape[0]
    assert Cin == C4, "residual add requires inplanes == planes*4 (stride=1, no downsample)"

    Cin_p = _rup(Cin, LANE)
    Cw_p = _rup(Cw, LANE)
    C4_p = _rup(C4, LANE)
    Cr_p = _rup(Cr, LANE)

    x_nhwc = jnp.transpose(x_nchw, (0, 2, 3, 1))                  # [N,H,W,Cin] f32
    x_pad = _pad_to(x_nhwc, (N, H, W, Cin_p))                     # zero channel padding
    M = N * H * W

    # ---- conv1 (1x1) + bn1 + relu : bf16 fused matmul ----
    w1 = _pad_to(p['conv1_w'][:, :, 0, 0].T, (Cin_p, Cw_p)).astype(jnp.bfloat16)
    s1, b1 = fold_bn(**p['bn1'])
    s1, b1 = _pad_to(s1, (1, Cw_p)), _pad_to(b1, (1, Cw_p))
    h1 = fused_matmul_bn(x_pad.reshape(M, Cin_p).astype(jnp.bfloat16),
                         w1, s1, b1, apply_relu=True, out_dtype=jnp.bfloat16, tm=256)
    h1 = h1.reshape(N, H, W, Cw_p)                                # bf16

    # ---- conv2 (3x3, dilation d) + bn2 + relu : per-sample halo kernel ----
    h1_halo = jnp.pad(h1, ((0, 0), (d, d), (d, d), (0, 0)))       # [N,H+2d,W+2d,Cw_p] bf16
    w2 = jnp.transpose(p['conv2_w'], (2, 3, 1, 0)).reshape(9, Cw, Cw)   # [tap, in, out]
    w2 = _pad_to(w2, (9, Cw_p, Cw_p)).astype(jnp.bfloat16)
    s2, b2 = fold_bn(**p['bn2'])
    s2, b2 = _pad_to(s2, (1, Cw_p)), _pad_to(b2, (1, Cw_p))
    h2 = conv3x3_bn_relu(h1_halo, w2, s2, b2, H=H, W=W, d=d)      # [N, H*W, Cw_p] bf16

    # ---- conv3 (1x1) + bn3 + ContextBlock + residual + relu : fused kernel ----
    w3 = _pad_to(p['conv3_w'][:, :, 0, 0].T, (Cw_p, C4_p)).astype(jnp.bfloat16)
    s3, b3 = fold_bn(**p['bn3'])
    s3, b3 = _pad_to(s3, (1, C4_p)), _pad_to(b3, (1, C4_p))
    wm = _pad_to(p['mask_w'][0, :, 0, 0].reshape(C4, 1), (C4_p, 1))
    bm = p['mask_b'].reshape(1, 1)
    wa1 = _pad_to(p['ca1_w'][:, :, 0, 0].T, (C4_p, Cr_p))
    ba1 = _pad_to(p['ca1_b'].reshape(1, Cr), (1, Cr_p))
    lnw = _pad_to(p['ln_w'].reshape(1, Cr), (1, Cr_p))
    lnb = _pad_to(p['ln_b'].reshape(1, Cr), (1, Cr_p))
    wa2 = _pad_to(p['ca2_w'][:, :, 0, 0].T, (Cr_p, C4_p))
    ba2 = _pad_to(p['ca2_b'].reshape(1, C4), (1, C4_p))
    res = x_pad.reshape(N, H * W, Cin_p)                          # f32 residual (Cin==C4)

    out = conv3_gcb_residual_relu(h2, res, w3, s3, b3, wm, bm,
                                  wa1, ba1, lnw, lnb, wa2, ba2, cr=Cr)
    out = out[:, :, :C4].reshape(N, H, W, C4)
    return jnp.transpose(out, (0, 3, 1, 2))


def bottleneck_forward_ref(x, p):
    """Pure-JAX f32 reference mirroring the PyTorch forward (NCHW)."""
    def conv(x, w, stride=1, padding=0, dilation=1):
        return jax.lax.conv_general_dilated(
            x, w, (stride, stride), [(padding, padding)] * 2,
            rhs_dilation=(dilation, dilation),
            dimension_numbers=('NCHW', 'OIHW', 'NCHW'))

    def bn(x, bnp):
        s = bnp['gamma'] / jnp.sqrt(bnp['var'] + EPS_BN)
        b = bnp['beta'] - bnp['mean'] * s
        return x * s[None, :, None, None] + b[None, :, None, None]

    relu = jax.nn.relu
    d = p['dilation']
    out = relu(bn(conv(x, p['conv1_w']), p['bn1']))
    out = relu(bn(conv(out, p['conv2_w'], padding=d, dilation=d), p['bn2']))
    out = bn(conv(out, p['conv3_w']), p['bn3'])

    N, C, H, W = out.shape
    logits = (conv(out, p['mask_w']) + p['mask_b'].reshape(1, 1, 1, 1)).reshape(N, H * W)
    attn = jax.nn.softmax(logits, axis=1)
    context = jnp.einsum('ncs,ns->nc', out.reshape(N, C, H * W), attn)     # [N, C]
    t = context @ p['ca1_w'][:, :, 0, 0].T + p['ca1_b'][None, :]           # [N, Cr]
    mu = jnp.mean(t, axis=1, keepdims=True)
    var = jnp.mean((t - mu) ** 2, axis=1, keepdims=True)
    t = (t - mu) / jnp.sqrt(var + EPS_LN) * p['ln_w'][None, :] + p['ln_b'][None, :]
    t = relu(t)
    add = t @ p['ca2_w'][:, :, 0, 0].T + p['ca2_b'][None, :]               # [N, C]
    out = out + add[:, :, None, None]
    return relu(out + x)


# ---------------------------------- main ------------------------------------ #

if __name__ == "__main__":
    key = jax.random.PRNGKey(0)
    kx, kp = jax.random.split(key)

    # NOTE: small sanity-check shapes only; do NOT tune tile sizes against these.
    N, H, W = 2, 16, 16
    planes, ratio = 4, 0.25
    inplanes = planes * 4          # residual add requires inplanes == planes*4
    x = jax.random.normal(kx, (N, inplanes, H, W), jnp.float32)
    params = init_params(kp, inplanes, planes, ratio)

    out = jax.block_until_ready(bottleneck_forward_pallas(x, params))
    ref = bottleneck_forward_ref(x, params)

    assert out.shape == x.shape
    err = float(jnp.max(jnp.abs(out - ref)))
    # bf16 matmul operands (f32 accumulate/epilogue) -> bf16-appropriate tolerance
    assert jnp.allclose(out, ref, rtol=2e-2, atol=2e-2), f"max abs err = {err}"
    print("KERNEL_OK")
</pallas_src>

<mosaic_0001>
module attributes {stable_mosaic.version = 11 : i64} {
  func.func @_mm_bn_kernel(%arg0: i32, %arg1: memref<256x128xbf16, #tpu.memory_space<vmem>>, %arg2: memref<128x128xbf16, #tpu.memory_space<vmem>>, %arg3: memref<1x128xf32, #tpu.memory_space<vmem>>, %arg4: memref<1x128xf32, #tpu.memory_space<vmem>>, %arg5: memref<256x128xbf16, #tpu.memory_space<vmem>>) attributes {dimension_semantics = [#tpu.dimension_semantics<parallel>], iteration_bounds = array<i64: 2>, scalar_prefetch = 0 : i64, scratch_operands = 0 : i64, tpu.core_type = #tpu.core_type<tc>, window_params = [{transform_indices = @transform_0, window_bounds = array<i64: 256, 128>}, {pipeline_mode = #tpu.pipeline_mode<synchronous>, transform_indices = @transform_1, window_bounds = array<i64: 128, 128>}, {pipeline_mode = #tpu.pipeline_mode<synchronous>, transform_indices = @transform_2, window_bounds = array<i64: 1, 128>}, {pipeline_mode = #tpu.pipeline_mode<synchronous>, transform_indices = @transform_3, window_bounds = array<i64: 1, 128>}, {transform_indices = @transform_4, window_bounds = array<i64: 256, 128>}]} {
    %c0 = arith.constant 0 : index
    %c0_0 = arith.constant 0 : index
    %0 = vector.load %arg1[%c0, %c0_0] : memref<256x128xbf16, #tpu.memory_space<vmem>>, vector<256x128xbf16>
    %c0_1 = arith.constant 0 : index
    %c0_2 = arith.constant 0 : index
    %1 = vector.load %arg2[%c0_1, %c0_2] : memref<128x128xbf16, #tpu.memory_space<vmem>>, vector<128x128xbf16>
    %cst = arith.constant dense<0.000000e+00> : vector<256x128xf32>
    %2 = tpu.matmul %0, %1, %cst {dimension_numbers = #tpu.dot_dimension_numbers<[1], [0], [0], [1], [0, 0, 1, 1], [], []>} : vector<256x128xbf16>, vector<128x128xbf16>, vector<256x128xf32> -> vector<256x128xf32>
    %c0_3 = arith.constant 0 : index
    %c0_4 = arith.constant 0 : index
    %3 = vector.load %arg3[%c0_3, %c0_4] : memref<1x128xf32, #tpu.memory_space<vmem>>, vector<1x128xf32>
    %4 = vector.broadcast %3 : vector<1x128xf32> to vector<256x128xf32>
    %5 = arith.mulf %2, %4 : vector<256x128xf32>
    %c0_5 = arith.constant 0 : index
    %c0_6 = arith.constant 0 : index
    %6 = vector.load %arg4[%c0_5, %c0_6] : memref<1x128xf32, #tpu.memory_space<vmem>>, vector<1x128xf32>
    %7 = vector.broadcast %6 : vector<1x128xf32> to vector<256x128xf32>
    %8 = arith.addf %5, %7 : vector<256x128xf32>
    %cst_7 = arith.constant 0.000000e+00 : f32
    %9 = vector.broadcast %cst_7 : f32 to vector<256x128xf32>
    %10 = arith.maximumf %8, %9 : vector<256x128xf32>
    %11 = arith.truncf %10 : vector<256x128xf32> to vector<256x128xbf16>
    %c0_8 = arith.constant 0 : index
    %c0_9 = arith.constant 0 : index
    %12 = vector.load %arg5[%c0_8, %c0_9] : memref<256x128xbf16, #tpu.memory_space<vmem>>, vector<256x128xbf16>
    tpu.vector_store %arg5[%c0_8, %c0_9], %11 {strides = array<i32>} : memref<256x128xbf16, #tpu.memory_space<vmem>>, vector<256x128xbf16>,
    return
  }
  func.func @transform_0(%arg0: i32) -> (i32, i32) {
    %c0_i32 = arith.constant 0 : i32
    %c0_i32_0 = arith.constant 0 : i32
    return %arg0, %c0_i32 : i32, i32
  }
  func.func @transform_1(%arg0: i32) -> (i32, i32) {
    %c0_i32 = arith.constant 0 : i32
    %c0_i32_0 = arith.constant 0 : i32
    %c0_i32_1 = arith.constant 0 : i32
    return %c0_i32, %c0_i32_0 : i32, i32
  }
  func.func @transform_2(%arg0: i32) -> (i32, i32) {
    %c0_i32 = arith.constant 0 : i32
    %c0_i32_0 = arith.constant 0 : i32
    %c0_i32_1 = arith.constant 0 : i32
    return %c0_i32, %c0_i32_0 : i32, i32
  }
  func.func @transform_3(%arg0: i32) -> (i32, i32) {
    %c0_i32 = arith.constant 0 : i32
    %c0_i32_0 = arith.constant 0 : i32
    %c0_i32_1 = arith.constant 0 : i32
    return %c0_i32, %c0_i32_0 : i32, i32
  }
  func.func @transform_4(%arg0: i32) -> (i32, i32) {
    %c0_i32 = arith.constant 0 : i32
    %c0_i32_0 = arith.constant 0 : i32
    return %arg0, %c0_i32 : i32, i32
  }
}

</mosaic_0001>

<bundles_post_ra>
// kernel: tpu_custom_call.1
= control target key start
LH: loop header
LB: loop body
LE: loop exit
PB: predicated region body
PF: predicated region fallthrough
CT: control target
= control target key end

     0   :  { %9 = vsyncpa [#allocation3], 0  ;;  %s1526_s0 = inlined_call_operand.hbm [shape: bf16[512,128], index: 0, kind: input, shape index: {}]   ;;  %s1527_s1 = inlined_call_operand.hbm [shape: bf16[128,128], index: 1, kind: input, shape index: {}]   ;;  %s1528_s2 = inlined_call_operand.vmem [shape: f32[1,128], index: 2, kind: input, shape index: {}]   ;;  %s1529_s3 = inlined_call_operand.vmem [shape: f32[1,128], index: 3, kind: input, shape index: {}]   ;;  %s1530_s4 = inlined_call_operand.hbm [shape: bf16[512,128], index: 4, kind: output, shape index: {}]  }
   0x1   :  { %11 = vsyncpa [#allocation3 + $0x1], 0 }
   0x2   :  { %12 = vsyncpa [#allocation6], 0 }
   0x3   :  { %13 = vsyncpa [#allocation4], 0 }
   0x4   :  { %15 = vsyncpa [#allocation4 + $0x1], 0  ;;  %s1267_s15 = smov 0   ;;  %s1269_s16 = smov 0  }
   0x5   :  { %s1271_s17 = smov 0   ;;  %s1273_s18 = smov 0  }
   0x6 LB: > { %s1288_s19 = sadd.s32 4294967295, %s1235_s18   ;;  %s785_s20 = sadd.s32 4294967294, %s1235_s18   ;;  %s1235_s18 = sphi %s1273_s18, %s1540_s18   ;;  %s1231_s17 = sphi %s1271_s17, %s1539_s17   ;;  %s1227_s16 = sphi %s1269_s16, %s1538_s16   ;;  %s1223_s15 = sphi %s1267_s15, %s1537_s15  }
   0x7   : > { %p41_p0 = scmp.ne.s32.totalorder %s1227_s16, %s1223_s15  ;;  %p42_p1 = scmp.eq.s32.totalorder %s1288_s19, 0 }
   0x8   : > { %p128_p2 = scmp.eq.s32.totalorder %s1288_s19, 1  ;;  %p134_p3 = scmp.eq.s32.totalorder %s785_s20, 1 }
   0x9   : > { %p1297_p4 = por %p42_p1, %p41_p0  ;;  %p786_p5 = scmp.ge.s32.totalorder %s1235_s18, 1 }
   0xa   : > { %p1302_p6 = por %p134_p3, %p41_p0  ;;  %p141_p7 = scmp.lt.s32.totalorder %s1235_s18, 3 }
   0xb   : > { %s152_s25 = sshll.u32 %s1527_s1, 4  ;;  %s1237_s27 = smov [#allocation5]   ;;  %s153_s25 = int_to_ptr.hbm [resolvable:$true] %s152_s25 }
   0xc   : > { %p1310_p8 = pnand %p786_p5, %p141_p7  ;;  %s154_s28 = sshll.u32 %s1237_s27, 4  ;;  %s155_s28 = int_to_ptr.vmem [resolvable:$true] %s154_s28 }
   0xd   : > { %s1320_s29 = sadd.s32 1, %s1235_s18   ;;  %s1238_s30 = smov 64  }
   0xe   : > { %p1050_p9 = pneg %p1310_p8  ;;  %s1239_s5 = smov 4  }
   0xf   : > { %s25_s6 = ssub.s32 %s1235_s18, %s1320_s29  ;;  %s28_s7 = sadd.s32 1, %s1231_s17 }
  0x10   : > { %p1051_p10 = pnand %p1050_p9, %p42_p1  ;;  %p26_p12 = scmp.eq.s32.totalorder %s25_s6, 0 }
  0x11   : > { %p35_p13 = scmp.ne.s32.totalorder %s1231_s17, %s1227_s16  ;;  %p36_p0 = scmp.eq.s32.totalorder %s1235_s18, 0 }
  0x12   : > { %1053 = dma.hbm_to_vmem [thread:$0]  (!%p1051_p10), %s153_s25, 1024, %s155_s28, [#allocation6], %s1238_s30, %s1238_s30, %s1239_s5  }
  0x13   : > { %s1332_s8 = scalar_select %p26_p12, %s1231_s17, %s28_s7  }
  0x14   : > { %p1336_p3 = por %p128_p2, %p35_p13  ;;  %p1063_p5 = scmp.lt.s32.totalorder %s1235_s18, 2 }
  0x15   : > { %s174_s10 = sand.u32 1, %s1231_s17   ;;  %s897_s11 = sshll.u32 %s1235_s18, 7 }
  0x16   : > { %p37_p7 = por %p36_p0, %p35_p13  ;;  %s789_s12 = sshll.u32 %s174_s10, 7 }
  0x17   : > { %s183_s20 = scalar_lea.hbm %s1526_s0, %s897_s11  ;;  %s178_s24 = scalar_lea.vmem [#allocation2], %s789_s12 }
  0x18   : > { %s184_s23 = sshll.u32 %s183_s20, 4  ;;  %s186_s25 = sshll.u32 %s178_s24, 4  ;;  %s185_s23 = int_to_ptr.hbm [resolvable:$true] %s184_s23  ;;  %s187_s25 = int_to_ptr.vmem [resolvable:$true] %s186_s25 }
  0x19   : > { %p1346_p9 = pnand %p1063_p5, %p37_p7  ;;  %s175_s28 = scalar_lea.sflag [#allocation3], %s174_s10 }
  0x1a   : > { %s1135_s6 = sshra.s32 %s185_s23, 4  ;;  %s1142_s12 = scalar_lea.hbm %s1526_s0, 256  ;;  %s1136_s6 = int_to_ptr.hbm [resolvable:$true] %s1135_s6 }
  0x1b   : > { %s1137_s7 = scalar_lea.hbm %s1136_s6, 128  ;;  %p1139_p10 = pneg %p1346_p9 }
  0x1c   : > { %p1138_p2 = scmp.ne.s32.totalorder %s1136_s6, %s1137_s7  ;;  %p1143_p0 = scmp.lt.s32.totalorder %s1136_s6, %s1526_s0 }
  0x1d   : > { %p1144_p5 = scmp.lt.s32.totalorder %s1142_s12, %s1137_s7 }
  0x1e   : > { %p1140_p12 = pnand %p1139_p10, %p1138_p2 }
  0x1f   : > { %p1145_p7 = por %p1144_p5, %p1143_p0 }
  0x20   : > { %p1141_p13 = pneg %p1140_p12 }
  0x22   : > { %p1146_p11 = pnand %p1145_p7, %p1141_p13 }
  0x24   : > { %1149 = shalt.err (!%p1146_p11)
}
  0x25   : > { %1057 = dma.hbm_to_vmem [thread:$0]  (!%p1346_p9), %s185_s23, 2048, %s187_s25, %s175_s28, %s1238_s30, %s1238_s30, %s1239_s5  }
  0x26   : > { %198 = sbr.rel (%p1310_p8) target bundleno = 280 (0x118), region = 36  ;;  %s1366_s10 = sand.u32 (!%p1310_p8), 1, %s1227_s16  }
  0x27   : > { %s793_s24 = sshll.u32 (!%p1310_p8), %s1366_s10, 7  ;;  %s201_s6 = scalar_lea.sflag (!%p1310_p8), [#allocation3], %s1366_s10 }
  0x28   : > { %s1372_s7 = scalar_lea.vmem (!%p1310_p8), [#allocation2], %s793_s24 }
  0x2b   : > { %1210 = dma.done.wait (%p1297_p4), %s201_s6, 2048  }
  0x2c   : > { %1212 = vsyncadd (%p1297_p4), %s201_s6, 4294965248 }
  0x2d   : > { %1214 = dma.done.wait (%p42_p1), [#allocation6], 1024  }
  0x2e   : > { %1216 = vsyncadd (%p42_p1), [#allocation6], 4294966272  ;;  %v921_v0 = vld [vmem:[#allocation5 + $0x38] sm:$0xff]  ;;  %v920_v1 = vld [vmem:[#allocation5 + $0x30] sm:$0xff]  ;;  %s1424_s23 = scalar_lea.vmem [#allocation7], %s793_s24  ;;  %s922_s25 = sshll.u32 %s1288_s19, 7 }
  0x2f   : > { %429 = vmatpush.bf16.msra.mxu0 %v921_v0  ;;  %1018 = vmatpush.bf16.msra.mxu1 %v921_v0  ;;  %v919_v2 = vld [vmem:[#allocation5 + $0x28] sm:$0xff]  ;;  %v918_v3 = vld [vmem:[#allocation5 + $0x20] sm:$0xff]  ;;  %v917_v4 = vld [vmem:[#allocation5 + $0x18] sm:$0xff]  ;;  %s698_s11 = scalar_lea.hbm %s1530_s4, %s922_s25  ;;  %s699_s19 = sshll.u32 %s1424_s23, 4  ;;  %s700_s19 = int_to_ptr.vmem [resolvable:$true] %s699_s19 }
  0x30   : > { %1019 = vmatpush.bf16.msra.mxu2 %v921_v0  ;;  %1020 = vmatpush.bf16.msra.mxu3 %v921_v0  ;;  %v916_v5 = vld [vmem:[#allocation5 + $0x10] sm:$0xff]  ;;  %v915_v6 = vld [vmem:[#allocation5 + $0x8] sm:$0xff]  ;;  %v914_v7 = vld [vmem:[#allocation5] sm:$0xff]  ;;  %s701_s13 = sshll.u32 %s698_s11, 4  ;;  %s687_s12 = scalar_lea.sflag [#allocation4], %s1366_s10  ;;  %s702_s13 = int_to_ptr.hbm [resolvable:$true] %s701_s13 }
  0x31   : > { %v898_v8 = vld [vmem:[%s1372_s7] sm:$0xff]  ;;  %v899_v12 = vld [vmem:[%s1372_s7 + $0x8] sm:$0xff]  ;;  %v900_v16 = vld [vmem:[%s1372_s7 + $0x10] sm:$0xff]  ;;  %s1179_s14 = sshra.s32 %s702_s13, 4  ;;  %s1180_s14 = int_to_ptr.hbm [resolvable:$true] %s1179_s14 }
  0x32   : > { %v902_v9 = vld [vmem:[%s1372_s7 + $0x20] sm:$0xff]  ;;  %v903_v13 = vld [vmem:[%s1372_s7 + $0x28] sm:$0xff]  ;;  %v904_v17 = vld [vmem:[%s1372_s7 + $0x30] sm:$0xff]  ;;  %s1181_s20 = scalar_lea.hbm %s1180_s14, 128  ;;  %p1186_p11 = scmp.lt.s32.totalorder %s1180_s14, %s1530_s4 }
  0x33   : > { %430 = vmatpush.bf16.msra.mxu0 %v920_v1  ;;  %1021 = vmatpush.bf16.msra.mxu1 %v920_v1  ;;  %v906_v10 = vld [vmem:[%s1372_s7 + $0x40] sm:$0xff]  ;;  %v907_v14 = vld [vmem:[%s1372_s7 + $0x48] sm:$0xff]  ;;  %v908_v18 = vld [vmem:[%s1372_s7 + $0x50] sm:$0xff]  ;;  %p1182_p1 = scmp.ne.s32.totalorder %s1180_s14, %s1181_s20 }
  0x34   : > { %1022 = vmatpush.bf16.msra.mxu2 %v920_v1  ;;  %1023 = vmatpush.bf16.msra.mxu3 %v920_v1  ;;  %v910_v11 = vld [vmem:[%s1372_s7 + $0x60] sm:$0xff]  ;;  %v911_v15 = vld [vmem:[%s1372_s7 + $0x68] sm:$0xff]  ;;  %v912_v19 = vld [vmem:[%s1372_s7 + $0x70] sm:$0xff] }
  0x35   : > { %v901_v20 = vld [vmem:[%s1372_s7 + $0x18] sm:$0xff]  ;;  %v1401_v26 = vld [vmem:[%s1528_s2] ss:$0 sm:$0xff]  ;;  %p1183_p4 = pnand %p1182_p1, %p1336_p3 }
  0x36   : > { %v905_v21 = vld [vmem:[%s1372_s7 + $0x38] sm:$0xff]  ;;  %v1407_v28 = vld [vmem:[%s1529_s3] ss:$0 sm:$0xff] }
  0x37   : > { %431 = vmatpush.bf16.msra.mxu0 %v919_v2  ;;  %1024 = vmatpush.bf16.msra.mxu1 %v919_v2  ;;  %v909_v22 = vld [vmem:[%s1372_s7 + $0x58] sm:$0xff]  ;;  %p1184_p8 = pneg %p1183_p4 }
  0x38   : > { %1025 = vmatpush.bf16.msra.mxu2 %v919_v2  ;;  %1026 = vmatpush.bf16.msra.mxu3 %v919_v2  ;;  %v913_v23 = vld [vmem:[%s1372_s7 + $0x78] sm:$0xff]  ;;  %s1185_s7 = scalar_lea.hbm %s1530_s4, 256 }
  0x39   : > { %p1187_p9 = scmp.lt.s32.totalorder %s1185_s7, %s1181_s20 }
  0x3b   : > { %432 = vmatpush.bf16.msra.mxu0 %v918_v3  ;;  %1027 = vmatpush.bf16.msra.mxu1 %v918_v3  ;;  %p1188_p2 = por %p1187_p9, %p1186_p11 }
  0x3c   : > { %1028 = vmatpush.bf16.msra.mxu2 %v918_v3  ;;  %1029 = vmatpush.bf16.msra.mxu3 %v918_v3 }
  0x3d   : > { %p1189_p10 = pnand %p1188_p2, %p1184_p8 }
  0x3f   : > { %433 = vmatpush.bf16.msra.mxu0 %v917_v4  ;;  %1030 = vmatpush.bf16.msra.mxu1 %v917_v4 }
  0x40   : > { %1031 = vmatpush.bf16.msra.mxu2 %v917_v4  ;;  %1032 = vmatpush.bf16.msra.mxu3 %v917_v4 }
  0x43   : > { %434 = vmatpush.bf16.msra.mxu0 %v916_v5  ;;  %1033 = vmatpush.bf16.msra.mxu1 %v916_v5 }
  0x44   : > { %1034 = vmatpush.bf16.msra.mxu2 %v916_v5  ;;  %1035 = vmatpush.bf16.msra.mxu3 %v916_v5 }
  0x47   : > { %435 = vmatpush.bf16.msra.mxu0 %v915_v6  ;;  %1036 = vmatpush.bf16.msra.mxu1 %v915_v6 }
  0x48   : > { %1037 = vmatpush.bf16.msra.mxu2 %v915_v6  ;;  %1038 = vmatpush.bf16.msra.mxu3 %v915_v6 }
  0x4b   : > { %436 = vmatpush.bf16.msra.mxu0 %v914_v7  ;;  %1039 = vmatpush.bf16.msra.mxu1 %v914_v7 }
  0x4c   : > { %1040 = vmatpush.bf16.msra.mxu2 %v914_v7  ;;  %1041 = vmatpush.bf16.msra.mxu3 %v914_v7 }
  0x4e   : > { %437 = vmatmul.bf16.vlgmr.msra.gmra.mxu0 %v898_v8  ;;  %457 = vmatmul.bf16.vlgmr.msra.gmra.mxu1 %v902_v9 }
  0x4f   : > { %477 = vmatmul.bf16.vlgmr.msra.gmra.mxu2 %v906_v10  ;;  %497 = vmatmul.bf16.vlgmr.msra.gmra.mxu3 %v910_v11 }
  0x5e   : > { %442 = vmatmul.bf16.gmra.mxu0 %v899_v12  ;;  %462 = vmatmul.bf16.gmra.mxu1 %v903_v13 }
  0x5f   : > { %482 = vmatmul.bf16.gmra.mxu2 %v907_v14  ;;  %502 = vmatmul.bf16.gmra.mxu3 %v911_v15 }
  0x6e   : > { %447 = vmatmul.bf16.gmra.mxu0 %v900_v16  ;;  %467 = vmatmul.bf16.gmra.mxu1 %v904_v17 }
  0x6f   : > { %487 = vmatmul.bf16.gmra.mxu2 %v908_v18  ;;  %507 = vmatmul.bf16.gmra.mxu3 %v912_v19 }
  0x7e   : > { %452 = vmatmul.bf16.gmra.mxu0 %v901_v20  ;;  %472 = vmatmul.bf16.gmra.mxu1 %v905_v21 }
  0x7f   : > { %492 = vmatmul.bf16.gmra.mxu2 %v909_v22  ;;  %512 = vmatmul.bf16.gmra.mxu3 %v913_v23 }
  0xcb   : > { %v438_v24 = vpop.f32.mrf.mxu0  ;;  %v458_v25 = vpop.f32.mrf.mxu1 }
  0xcc   : > { %v522_v27 = vmul.f32 %v1401_v26, %v438_v24  ;;  %v530_v29 = vmul.f32 %v1401_v26, %v458_v25 }
  0xce   : > { %v558_v34 = vadd.f32 %v1407_v28, %v522_v27  ;;  %v566_v35 = vadd.f32 %v1407_v28, %v530_v29 }
  0xd0   : > { %v590_v42 = vmax.f32 %v558_v34, 0.0  ;;  %v598_v43 = vmax.f32 %v566_v35, 0.0 }
  0xd2   : > { %v478_v30 = vpop.f32.mrf.mxu2  ;;  %v498_v31 = vpop.f32.mrf.mxu3 }
  0xd3   : > { %v440_v32 = vpop.f32.mrf.mxu0  ;;  %v460_v33 = vpop.f32.mrf.mxu1  ;;  %v538_v40 = vmul.f32 %v1401_v26, %v478_v30  ;;  %v546_v41 = vmul.f32 %v1401_v26, %v498_v31 }
  0xd4   : > { %v523_v36 = vmul.f32 %v1401_v26, %v440_v32  ;;  %v531_v37 = vmul.f32 %v1401_v26, %v460_v33 }
  0xd5   : > { %v574_v50 = vadd.f32 %v1407_v28, %v538_v40  ;;  %v582_v51 = vadd.f32 %v1407_v28, %v546_v41 }
  0xd6   : > { %v559_v38 = vadd.f32 %v1407_v28, %v523_v36  ;;  %v567_v39 = vadd.f32 %v1407_v28, %v531_v37 }
  0xd7   : > { %v606_v58 = vmax.f32 %v574_v50, 0.0  ;;  %v614_v59 = vmax.f32 %v582_v51, 0.0 }
  0xd8   : > { %v591_v44 = vmax.f32 %v559_v38, 0.0  ;;  %v599_v45 = vmax.f32 %v567_v39, 0.0 }
  0xda   : > { %v926_v46 = vpack.c.bf16 %v591_v44, %v590_v42  ;;  %v946_v47 = vpack.c.bf16 %v599_v45, %v598_v43  ;;  %v480_v48 = vpop.f32.mrf.mxu2  ;;  %v500_v49 = vpop.f32.mrf.mxu3 }
  0xdb   : > { %v539_v52 = vmul.f32 %v1401_v26, %v480_v48  ;;  %v547_v53 = vmul.f32 %v1401_v26, %v500_v49  ;;  %v443_v54 = vpop.f32.mrf.mxu0  ;;  %v463_v55 = vpop.f32.mrf.mxu1 }
  0xdc   : > { %927 = vst [vmem:[%s1424_s23] sm:$0xff] %v926_v46   ;;  %v524_v62 = vmul.f32 %v1401_v26, %v443_v54  ;;  %v532_v63 = vmul.f32 %v1401_v26, %v463_v55 }
  0xdd   : > { %1006 = vst [vmem:[%s1424_s23 + $0x20] sm:$0xff] %v946_v47   ;;  %v575_v56 = vadd.f32 %v1407_v28, %v539_v52  ;;  %v583_v57 = vadd.f32 %v1407_v28, %v547_v53 }
  0xde   : > { %v560_v6 = vadd.f32 %v1407_v28, %v524_v62  ;;  %v568_v7 = vadd.f32 %v1407_v28, %v532_v63 }
  0xdf   : > { %v607_v60 = vmax.f32 %v575_v56, 0.0  ;;  %v615_v61 = vmax.f32 %v583_v57, 0.0 }
  0xe0   : > { %v592_v14 = vmax.f32 %v560_v6, 0.0  ;;  %v600_v15 = vmax.f32 %v568_v7, 0.0 }
  0xe1   : > { %v966_v0 = vpack.c.bf16 %v607_v60, %v606_v58  ;;  %v986_v1 = vpack.c.bf16 %v615_v61, %v614_v59 }
  0xe2   : > { %v483_v2 = vpop.f32.mrf.mxu2  ;;  %v503_v3 = vpop.f32.mrf.mxu3 }
  0xe3   : > { %1010 = vst [vmem:[%s1424_s23 + $0x40] sm:$0xff] %v966_v0   ;;  %v445_v4 = vpop.f32.mrf.mxu0  ;;  %v465_v5 = vpop.f32.mrf.mxu1  ;;  %v540_v12 = vmul.f32 %v1401_v26, %v483_v2  ;;  %v548_v13 = vmul.f32 %v1401_v26, %v503_v3 }
  0xe4   : > { %1014 = vst [vmem:[%s1424_s23 + $0x60] sm:$0xff] %v986_v1   ;;  %v525_v8 = vmul.f32 %v1401_v26, %v445_v4  ;;  %v533_v9 = vmul.f32 %v1401_v26, %v465_v5 }
  0xe5   : > { %v576_v22 = vadd.f32 %v1407_v28, %v540_v12  ;;  %v584_v23 = vadd.f32 %v1407_v28, %v548_v13 }
  0xe6   : > { %v561_v10 = vadd.f32 %v1407_v28, %v525_v8  ;;  %v569_v11 = vadd.f32 %v1407_v28, %v533_v9 }
  0xe7   : > { %v608_v32 = vmax.f32 %v576_v22, 0.0  ;;  %v616_v33 = vmax.f32 %v584_v23, 0.0 }
  0xe8   : > { %v593_v16 = vmax.f32 %v561_v10, 0.0  ;;  %v601_v17 = vmax.f32 %v569_v11, 0.0 }
  0xea   : > { %v931_v18 = vpack.c.bf16 %v593_v16, %v592_v14  ;;  %v951_v19 = vpack.c.bf16 %v601_v17, %v600_v15  ;;  %v485_v20 = vpop.f32.mrf.mxu2  ;;  %v505_v21 = vpop.f32.mrf.mxu3 }
  0xeb   : > { %v541_v24 = vmul.f32 %v1401_v26, %v485_v20  ;;  %v549_v25 = vmul.f32 %v1401_v26, %v505_v21  ;;  %v448_v27 = vpop.f32.mrf.mxu0  ;;  %v468_v29 = vpop.f32.mrf.mxu1 }
  0xec   : > { %1003 = vst [vmem:[%s1424_s23 + $0x8] sm:$0xff] %v931_v18   ;;  %v526_v36 = vmul.f32 %v1401_v26, %v448_v27  ;;  %v534_v37 = vmul.f32 %v1401_v26, %v468_v29 }
  0xed   : > { %1007 = vst [vmem:[%s1424_s23 + $0x28] sm:$0xff] %v951_v19   ;;  %v577_v30 = vadd.f32 %v1407_v28, %v541_v24  ;;  %v585_v31 = vadd.f32 %v1407_v28, %v549_v25 }
  0xee   : > { %v562_v44 = vadd.f32 %v1407_v28, %v526_v36  ;;  %v570_v45 = vadd.f32 %v1407_v28, %v534_v37 }
  0xef   : > { %v609_v34 = vmax.f32 %v577_v30, 0.0  ;;  %v617_v35 = vmax.f32 %v585_v31, 0.0 }
  0xf0   : > { %v594_v52 = vmax.f32 %v562_v44, 0.0  ;;  %v602_v53 = vmax.f32 %v570_v45, 0.0 }
  0xf1   : > { %v971_v38 = vpack.c.bf16 %v609_v34, %v608_v32  ;;  %v991_v39 = vpack.c.bf16 %v617_v35, %v616_v33 }
  0xf2   : > { %v488_v40 = vpop.f32.mrf.mxu2  ;;  %v508_v41 = vpop.f32.mrf.mxu3 }
  0xf3   : > { %1011 = vst [vmem:[%s1424_s23 + $0x48] sm:$0xff] %v971_v38   ;;  %v450_v42 = vpop.f32.mrf.mxu0  ;;  %v470_v43 = vpop.f32.mrf.mxu1  ;;  %v542_v50 = vmul.f32 %v1401_v26, %v488_v40  ;;  %v550_v51 = vmul.f32 %v1401_v26, %v508_v41 }
  0xf4   : > { %1015 = vst [vmem:[%s1424_s23 + $0x68] sm:$0xff] %v991_v39   ;;  %v527_v46 = vmul.f32 %v1401_v26, %v450_v42  ;;  %v535_v47 = vmul.f32 %v1401_v26, %v470_v43 }
  0xf5   : > { %v578_v60 = vadd.f32 %v1407_v28, %v542_v50  ;;  %v586_v61 = vadd.f32 %v1407_v28, %v550_v51 }
  0xf6   : > { %v563_v48 = vadd.f32 %v1407_v28, %v527_v46  ;;  %v571_v49 = vadd.f32 %v1407_v28, %v535_v47 }
  0xf7   : > { %v610_v4 = vmax.f32 %v578_v60, 0.0  ;;  %v618_v5 = vmax.f32 %v586_v61, 0.0 }
  0xf8   : > { %v595_v54 = vmax.f32 %v563_v48, 0.0  ;;  %v603_v55 = vmax.f32 %v571_v49, 0.0 }
  0xfa   : > { %v936_v56 = vpack.c.bf16 %v595_v54, %v594_v52  ;;  %v956_v57 = vpack.c.bf16 %v603_v55, %v602_v53  ;;  %v490_v58 = vpop.f32.mrf.mxu2  ;;  %v510_v59 = vpop.f32.mrf.mxu3 }
  0xfb   : > { %v543_v62 = vmul.f32 %v1401_v26, %v490_v58  ;;  %v551_v63 = vmul.f32 %v1401_v26, %v510_v59  ;;  %v453_v0 = vpop.f32.mrf.mxu0  ;;  %v473_v1 = vpop.f32.mrf.mxu1 }
  0xfc   : > { %1004 = vst [vmem:[%s1424_s23 + $0x10] sm:$0xff] %v936_v56   ;;  %v528_v8 = vmul.f32 %v1401_v26, %v453_v0  ;;  %v536_v9 = vmul.f32 %v1401_v26, %v473_v1 }
  0xfd   : > { %1008 = vst [vmem:[%s1424_s23 + $0x30] sm:$0xff] %v956_v57   ;;  %v579_v2 = vadd.f32 %v1407_v28, %v543_v62  ;;  %v587_v3 = vadd.f32 %v1407_v28, %v551_v63 }
  0xfe   : > { %v564_v16 = vadd.f32 %v1407_v28, %v528_v8  ;;  %v572_v17 = vadd.f32 %v1407_v28, %v536_v9 }
  0xff   : > { %v611_v6 = vmax.f32 %v579_v2, 0.0  ;;  %v619_v7 = vmax.f32 %v587_v3, 0.0 }
 0x100   : > { %v596_v24 = vmax.f32 %v564_v16, 0.0  ;;  %v604_v25 = vmax.f32 %v572_v17, 0.0 }
 0x101   : > { %v976_v10 = vpack.c.bf16 %v611_v6, %v610_v4  ;;  %v996_v11 = vpack.c.bf16 %v619_v7, %v618_v5 }
 0x102   : > { %v493_v12 = vpop.f32.mrf.mxu2  ;;  %v513_v13 = vpop.f32.mrf.mxu3 }
 0x103   : > { %1012 = vst [vmem:[%s1424_s23 + $0x50] sm:$0xff] %v976_v10   ;;  %v455_v14 = vpop.f32.mrf.mxu0  ;;  %v475_v15 = vpop.f32.mrf.mxu1  ;;  %v544_v22 = vmul.f32 %v1401_v26, %v493_v12  ;;  %v552_v23 = vmul.f32 %v1401_v26, %v513_v13 }
 0x104   : > { %1016 = vst [vmem:[%s1424_s23 + $0x70] sm:$0xff] %v996_v11   ;;  %v529_v18 = vmul.f32 %v1401_v26, %v455_v14  ;;  %v537_v19 = vmul.f32 %v1401_v26, %v475_v15 }
 0x105   : > { %v580_v34 = vadd.f32 %v1407_v28, %v544_v22  ;;  %v588_v35 = vadd.f32 %v1407_v28, %v552_v23 }
 0x106   : > { %v565_v20 = vadd.f32 %v1407_v28, %v529_v18  ;;  %v573_v21 = vadd.f32 %v1407_v28, %v537_v19 }
 0x107   : > { %v612_v40 = vmax.f32 %v580_v34, 0.0  ;;  %v620_v41 = vmax.f32 %v588_v35, 0.0 }
 0x108   : > { %v597_v27 = vmax.f32 %v565_v20, 0.0  ;;  %v605_v29 = vmax.f32 %v573_v21, 0.0 }
 0x10a   : > { %v941_v30 = vpack.c.bf16 %v597_v27, %v596_v24  ;;  %v961_v31 = vpack.c.bf16 %v605_v29, %v604_v25  ;;  %v495_v32 = vpop.f32.mrf.mxu2  ;;  %v515_v33 = vpop.f32.mrf.mxu3 }
 0x10b   : > { %v545_v36 = vmul.f32 %v1401_v26, %v495_v32  ;;  %v553_v37 = vmul.f32 %v1401_v26, %v515_v33 }
 0x10c   : > { %1005 = vst [vmem:[%s1424_s23 + $0x18] sm:$0xff] %v941_v30  }
 0x10d   : > { %1009 = vst [vmem:[%s1424_s23 + $0x38] sm:$0xff] %v961_v31   ;;  %v581_v38 = vadd.f32 %v1407_v28, %v545_v36  ;;  %v589_v39 = vadd.f32 %v1407_v28, %v553_v37 }
 0x10f   : > { %v613_v42 = vmax.f32 %v581_v38, 0.0  ;;  %v621_v26 = vmax.f32 %v589_v39, 0.0 }
 0x111   : > { %v981_v43 = vpack.c.bf16 %v613_v42, %v612_v40  ;;  %v1001_v44 = vpack.c.bf16 %v621_v26, %v620_v41 }
 0x113   : > { %1013 = vst [vmem:[%s1424_s23 + $0x58] sm:$0xff] %v981_v43  }
 0x114   : > { %1017 = vst [vmem:[%s1424_s23 + $0x78] sm:$0xff] %v1001_v44  }
 0x115   : > { %1192 = shalt.err (!%p1189_p10)
}
 0x116   : > { %s1240_s10 = smov 64   ;;  %s1241_s30 = smov 4  }
 0x117   : > { %1048 = dma.vmem_to_hbm [thread:$0]  (%p1336_p3), %s700_s19, 2048, %s702_s13, %s687_s12, %s1240_s10, %s1240_s10, %s1241_s30  }
 0x118 PF: > { %s716_s5 = sand.u32 1, %s1223_s15   ;;  %p1536_p12 = scmp.ge.s32.totalorder %s1235_s18, 2 }
 0x119   : > { %s717_s23 = scalar_lea.sflag [#allocation4], %s716_s5 }
 0x11a   : > { %p1059_p13 = pnand %p1536_p12, %p1302_p6 }
 0x11c   : > { %p1060_p0 = pneg %p1059_p13 }
 0x11e   : > { %1218 = dma.done.wait (%p1060_p0), %s717_s23, 2048  }
 0x11f   : > { %1220 = vsyncadd (%p1060_p0), %s717_s23, 4294965248  ;;  %p18_p5 = scmp.ge.s32.totalorder %s1320_s29, 4   ;;  %s1537_s15 = smov %s1227_s16 }
 0x120   : > { %s1538_s16 = smov %s1231_s17  ;;  %s1539_s17 = smov %s1332_s8 }
 0x121   : > { %s1540_s18 = smov %s1320_s29  ;;  %20 = sbr.rel (!%p18_p5) target bundleno = 6 (0x6), region = 85 }
 0x126   :  { %723 = vsyncpa [#allocation3], 1 }
 0x127   :  { %725 = vsyncpa [#allocation3 + $0x1], 1 }
 0x128   :  { %726 = vsyncpa [#allocation6], 1 }
 0x129   :  { %727 = vsyncpa [#allocation4], 1 }
 0x12a   :  { %729 = vsyncpa [#allocation4 + $0x1], 1 }

</bundles_post_ra>
